<compile_context>
chip_gen: v5e
topology: v5e:2x2
jax: 0.10.0
libtpu: 0.0.40
codegen_flags: <defaults>
</compile_context>

<pallas_src>
import functools

import jax
import jax.numpy as jnp
from jax.experimental import pallas as pl
from jax.experimental.pallas import tpu as pltpu

LANE = 128
SUBLANE = 8
BLOCK_ROWS_MAX = 1024          # (1024, 128) f32 tile = 512 KiB
FUSE_MAX_ELEMS = 256 * 1024    # <= 1 MiB f32 slab -> fused single pass


def _round_up(a, b):
    return -(-a // b) * b


# ---------------------------------------------------------------------------
# Fused single-pass kernels (whole slab resident in VMEM)
# ---------------------------------------------------------------------------
def _fused_kbit_kernel(x_ref, o_ref, *, n):
    x = x_ref[...].astype(jnp.float32)
    t = jnp.tanh(x)
    max_x = jnp.max(jnp.abs(t))          # zero padding is reduction-safe
    half_inv = 0.5 / max_x               # scalar, computed once
    qx = t * half_inv + 0.5
    qx = jnp.round(qx * n) * (1.0 / n)
    o_ref[...] = ((2.0 * qx - 1.0) * max_x).astype(o_ref.dtype)


def _fused_1bit_kernel(x_ref, o_ref, *, inv_count):
    x = x_ref[...].astype(jnp.float32)
    E = jnp.sum(jnp.abs(x)) * inv_count  # mean over the TRUE element count
    o_ref[...] = (jnp.sign(x) * E).astype(o_ref.dtype)


# ---------------------------------------------------------------------------
# Two-pass tiled kernels
# ---------------------------------------------------------------------------
def _max_abs_kernel(x_ref, o_ref, acc_ref):
    # elementwise max into an (8,128) scratch; cross-lane reduce only once.
    @pl.when(pl.program_id(0) == 0)
    def _():
        acc_ref[...] = jnp.zeros_like(acc_ref)

    x = jnp.abs(x_ref[...].astype(jnp.float32))
    x = x.reshape(-1, SUBLANE, LANE)                  # layout-preserving
    acc_ref[...] = jnp.maximum(acc_ref[...], jnp.max(x, axis=0))

    @pl.when(pl.program_id(0) == pl.num_programs(0) - 1)
    def _():
        o_ref[...] = jnp.max(acc_ref[...], keepdims=True)


def _sum_abs_kernel(x_ref, o_ref, acc_ref):
    @pl.when(pl.program_id(0) == 0)
    def _():
        acc_ref[...] = jnp.zeros_like(acc_ref)

    x = jnp.abs(x_ref[...].astype(jnp.float32))
    x = x.reshape(-1, SUBLANE, LANE)
    acc_ref[...] = acc_ref[...] + jnp.sum(x, axis=0)

    @pl.when(pl.program_id(0) == pl.num_programs(0) - 1)
    def _():
        o_ref[...] = jnp.sum(acc_ref[...], keepdims=True)


def _quant_kbit_kernel(x_ref, s_ref, o_ref, *, n):
    # s_ref (SMEM, f32[2]): [max_x = tanh(max|x|),  0.5 / max_x]
    max_x = s_ref[0]
    half_inv = s_ref[1]
    t = jnp.tanh(x_ref[...].astype(jnp.float32))
    qx = t * half_inv + 0.5
    qx = jnp.round(qx * n) * (1.0 / n)
    o_ref[...] = ((2.0 * qx - 1.0) * max_x).astype(o_ref.dtype)


def _quant_1bit_kernel(x_ref, e_ref, o_ref):
    # e_ref (SMEM, f32[1]): [E = mean|x|];  sign(x/E)*E == sign(x)*E  (E > 0)
    E = e_ref[0]
    x = x_ref[...].astype(jnp.float32)
    o_ref[...] = (jnp.sign(x) * E).astype(o_ref.dtype)


# ---------------------------------------------------------------------------
# Wrapper
# ---------------------------------------------------------------------------
def _to_slab(x, block_rows):
    """Flatten to a zero-padded (M, 128) slab in the ORIGINAL dtype."""
    xf = jnp.ravel(x)
    total = xf.size
    padded = _round_up(total, block_rows * LANE)
    if padded != total:
        xf = jnp.pad(xf, (0, padded - total))
    return xf.reshape(-1, LANE)


def _from_slab(y2, total, shape):
    yf = jnp.ravel(y2)
    if yf.size != total:
        yf = yf[:total]
    return yf.reshape(shape)


def _fw_forward_impl(x, bitW, force_two_pass):
    if bitW == 32:
        return x

    shape = x.shape
    dtype = x.dtype
    total = x.size

    # ---------------- fused single-pass path (typical conv weights) --------
    if total <= FUSE_MAX_ELEMS and not force_two_pass:
        x2 = _to_slab(x, SUBLANE)
        if bitW == 1:
            kern = functools.partial(_fused_1bit_kernel,
                                     inv_count=1.0 / float(total))
        else:
            kern = functools.partial(_fused_kbit_kernel,
                                     n=float(2 ** bitW - 1))
        y2 = pl.pallas_call(
            kern,
            out_shape=jax.ShapeDtypeStruct(x2.shape, dtype),
            in_specs=[pl.BlockSpec(memory_space=pltpu.MemorySpace.VMEM)],
            out_specs=pl.BlockSpec(memory_space=pltpu.MemorySpace.VMEM),
        )(x2)
        return _from_slab(y2, total, shape)

    # ---------------- two-pass tiled path -----------------------------------
    rows = -(-total // LANE)
    block_rows = min(BLOCK_ROWS_MAX, _round_up(rows, SUBLANE))
    x2 = _to_slab(x, block_rows)
    M = x2.shape[0]
    grid = (M // block_rows,)

    tile = pl.BlockSpec((block_rows, LANE), lambda i: (i, 0))
    scalar_out = pl.BlockSpec((1, 1), lambda i: (0, 0))
    smem = pl.BlockSpec(memory_space=pltpu.MemorySpace.SMEM)

    red_params = pltpu.CompilerParams(dimension_semantics=("arbitrary",))
    ew_params = pltpu.CompilerParams(dimension_semantics=("parallel",))

    if bitW == 1:
        ssum = pl.pallas_call(
            _sum_abs_kernel,
            out_shape=jax.ShapeDtypeStruct((1, 1), jnp.float32),
            grid=grid,
            in_specs=[tile],
            out_specs=scalar_out,
            scratch_shapes=[pltpu.VMEM((SUBLANE, LANE), jnp.float32)],
            compiler_params=red_params,
        )(x2)
        E = (ssum / jnp.float32(total)).reshape(1).astype(jnp.float32)
        y2 = pl.pallas_call(
            _quant_1bit_kernel,
            out_shape=jax.ShapeDtypeStruct(x2.shape, dtype),
            grid=grid,
            in_specs=[tile, smem],
            out_specs=tile,
            compiler_params=ew_params,
        )(x2, E)
    else:
        max_abs = pl.pallas_call(
            _max_abs_kernel,
            out_shape=jax.ShapeDtypeStruct((1, 1), jnp.float32),
            grid=grid,
            in_specs=[tile],
            out_specs=scalar_out,
            scratch_shapes=[pltpu.VMEM((SUBLANE, LANE), jnp.float32)],
            compiler_params=red_params,
        )(x2)
        max_x = jnp.tanh(max_abs)        # tanh monotone: tanh(max|x|)=max|tanh(x)|
        scal = jnp.concatenate(
            [max_x.reshape(1), (0.5 / max_x).reshape(1)]).astype(jnp.float32)
        y2 = pl.pallas_call(
            functools.partial(_quant_kbit_kernel, n=float(2 ** bitW - 1)),
            out_shape=jax.ShapeDtypeStruct(x2.shape, dtype),
            grid=grid,
            in_specs=[tile, smem],
            out_specs=tile,
            compiler_params=ew_params,
        )(x2, scal)

    return _from_slab(y2, total, shape)


_fw_forward_jit = functools.partial(jax.jit, static_argnums=(1, 2))(_fw_forward_impl)


def fw_forward(x, bitW, force_two_pass=False):
    """Pallas implementation of fw(bitW).forward(x)."""
    return _fw_forward_jit(x, int(bitW), bool(force_two_pass))


# ---------------------------------------------------------------------------
# Pure-JAX reference (mirrors the PyTorch module exactly)
# ---------------------------------------------------------------------------
def fw_reference(x, bitW):
    if bitW == 32:
        return x
    if bitW == 1:
        E = jnp.mean(jnp.abs(x))
        return jnp.sign(x / E) * E
    t = jnp.tanh(x)
    max_x = jnp.max(jnp.abs(t))
    qx = t / max_x * 0.5 + 0.5
    n = float(2 ** bitW - 1)
    qx = jnp.round(qx * n) / n
    return (2.0 * qx - 1.0) * max_x


if __name__ == "__main__":
    key = jax.random.PRNGKey(0)
    k1, k2 = jax.random.split(key)
    # small NCHW-style input consistent with a conv-net quantizer
    x_a = jax.random.normal(k1, (2, 4, 16, 16), dtype=jnp.float32)
    # ragged element count -> exercises the zero-padding path
    x_b = jax.random.normal(k2, (3, 5, 7, 11), dtype=jnp.float32)

    ok = True
    for x in (x_a, x_b):
        for bitW in (4, 2, 1, 32):
            y_ref = fw_reference(x, bitW)
            for force_two_pass in (False, True):   # exercise both code paths
                y = jax.block_until_ready(fw_forward(x, bitW, force_two_pass))
                ok = ok and bool(jnp.allclose(y, y_ref, atol=1e-5, rtol=1e-5))
                ok = ok and (y.shape == x.shape) and (y.dtype == x.dtype)

    if ok:
        print("KERNEL_OK")
</pallas_src>

<mosaic_0001>
module attributes {stable_mosaic.version = 11 : i64} {
  func.func @_fused_kbit_kernel(%arg0: memref<16x128xf32, #tpu.memory_space<vmem>>, %arg1: memref<16x128xf32, #tpu.memory_space<vmem>>) attributes {dimension_semantics = [], scalar_prefetch = 0 : i64, scratch_operands = 0 : i64, tpu.core_type = #tpu.core_type<tc>} {
    %c0 = arith.constant 0 : index
    %c0_0 = arith.constant 0 : index
    %0 = vector.load %arg0[%c0, %c0_0] : memref<16x128xf32, #tpu.memory_space<vmem>>, vector<16x128xf32>
    %1 = math.tanh %0 : vector<16x128xf32>
    %2 = math.absf %1 : vector<16x128xf32>
    %3 = vector.shape_cast %2 : vector<16x128xf32> to vector<1x16x128xf32>
    %cst = arith.constant dense<0xFF800000> : vector<1xf32>
    %4 = vector.multi_reduction <maximumf>, %3, %cst [1, 2] : vector<1x16x128xf32> to vector<1xf32>
    %5 = vector.shape_cast %4 : vector<1xf32> to vector<1x1x1xf32>
    %6 = vector.extract %5[0, 0, 0] : f32 from vector<1x1x1xf32>
    %cst_1 = arith.constant 5.000000e-01 : f32
    %7 = arith.divf %cst_1, %6 : f32
    %8 = vector.broadcast %7 : f32 to vector<16x128xf32>
    %9 = arith.mulf %1, %8 : vector<16x128xf32>
    %cst_2 = arith.constant 5.000000e-01 : f32
    %10 = vector.broadcast %cst_2 : f32 to vector<16x128xf32>
    %11 = arith.addf %9, %10 : vector<16x128xf32>
    %cst_3 = arith.constant 1.500000e+01 : f32
    %12 = vector.broadcast %cst_3 : f32 to vector<16x128xf32>
    %13 = arith.mulf %11, %12 : vector<16x128xf32>
    %14 = math.roundeven %13 : vector<16x128xf32>
    %cst_4 = arith.constant 0.0666666701 : f32
    %15 = vector.broadcast %cst_4 : f32 to vector<16x128xf32>
    %16 = arith.mulf %14, %15 : vector<16x128xf32>
    %cst_5 = arith.constant 2.000000e+00 : f32
    %17 = vector.broadcast %cst_5 : f32 to vector<16x128xf32>
    %18 = arith.mulf %17, %16 : vector<16x128xf32>
    %cst_6 = arith.constant 1.000000e+00 : f32
    %19 = vector.broadcast %cst_6 : f32 to vector<16x128xf32>
    %20 = arith.subf %18, %19 : vector<16x128xf32>
    %21 = vector.broadcast %6 : f32 to vector<16x128xf32>
    %22 = arith.mulf %20, %21 : vector<16x128xf32>
    %c0_7 = arith.constant 0 : index
    %c0_8 = arith.constant 0 : index
    %23 = vector.load %arg1[%c0_7, %c0_8] : memref<16x128xf32, #tpu.memory_space<vmem>>, vector<16x128xf32>
    tpu.vector_store %arg1[%c0_7, %c0_8], %22 {strides = array<i32>} : memref<16x128xf32, #tpu.memory_space<vmem>>, vector<16x128xf32>,
    return
  }
}

</mosaic_0001>

<bundles_post_ra>
// kernel: _fw_forward_impl.1
= control target key start
LH: loop header
LB: loop body
LE: loop exit
PB: predicated region body
PF: predicated region fallthrough
CT: control target
= control target key end

     0   :  { %s115_s0 = inlined_call_operand.vmem [shape: f32[16,128], index: 0, kind: input, shape index: {}]   ;;  %s116_s1 = inlined_call_operand.vmem [shape: f32[16,128], index: 1, kind: output, shape index: {}]  }
   0x1   :  { %v8_v0 = vld [vmem:[%s115_s0] sm:$0xff]  ;;  %v9_v1 = vld [vmem:[%s115_s0 + $0x8] sm:$0xff] }
   0x2   :  { %87 = vtanh.f32 %v8_v0 }
   0x3   :  { %89 = vtanh.f32 %v9_v1 }
   0x8   :  { %v88_v2 = vpop.eup %87 }
   0x9   :  { %v90_v3 = vpop.eup %89  ;;  %v12_v4 = vand.u32 2147483647, %v88_v2 }
   0xa   :  { %v13_v5 = vand.u32 2147483647, %v90_v3 }
   0xc   :  { %v14_v6 = vmax.f32 %v12_v4, %v13_v5 }
   0xe   :  { %15 = vmax.xlane.f32.xlu0 %v14_v6 }
  0x81   :  { %v16_v7 = vpop.xlane.xlu0 %15 }
  0x82   :  { %v17_v8 = vrot.slane %v16_v7, 4 }
  0x84   :  { %v18_v9 = vmax.f32 %v16_v7, %v17_v8 }
  0x86   :  { %v19_v10 = vrot.slane %v18_v9, 2 }
  0x88   :  { %v20_v11 = vmax.f32 %v18_v9, %v19_v10 }
  0x8a   :  { %v21_v12 = vrot.slane %v20_v11, 1 }
  0x8c   :  { %v22_v13 = vmax.f32 %v20_v11, %v21_v12 }
  0x8e   :  { %67 = vpush %v22_v13 }
  0xbf   :  { %s68_s10 = spop %67 }
  0xc0   :  { %v24_v14 = vstv %s68_s10 }
  0xc1   :  { %91 = vrcp.f32 %v24_v14  ;;  %v36_v18 = vand.u32 2147483648, %v24_v14  ;;  %v34_v20 = vand.u32 2147483647, %v24_v14  ;;  %vm30_vm1 = vweird.f32 %v24_v14 }
  0xc3   :  { %v37_v22 = vor.u32 1.1754944e-38, %v36_v18  ;;  %vm35_vm3 = vcmp.eq.f32.partialorder %v34_v20, 8.507059e+37 }
  0xc7   :  { %v92_v15 = vpop.eup %91 }
  0xc8   :  { %v26_v16 = vmul.f32 %v92_v15, %v24_v14  ;;  %vm31_vm0 = vweird.f32 %v92_v15 }
  0xc9   :  { %vm32_vm2 = vmor %vm30_vm1, %vm31_vm0 }
  0xca   :  { %v27_v17 = vsub.f32 1.0, %v26_v16 }
  0xcc   :  { %v28_v19 = vmul.f32 %v92_v15, %v27_v17 }
  0xce   :  { %v29_v21 = vadd.f32 %v92_v15, %v28_v19 }
  0xd0   :  { %v33_v23 = vsel %vm32_vm2, %v92_v15, %v29_v21 }
  0xd1   :  { %v38_v24 = vsel %vm35_vm3, %v37_v22, %v33_v23 }
  0xd2   :  { %69 = vpush %v38_v24 }
 0x103   :  { %s70_s0 = spop %69 }
 0x104   :  { %s40_s11 = smul.f32 0.5, %s70_s0 }
 0x106   :  { %v41_v25 = vstv %s40_s11 }
 0x107   :  { %v42_v26 = vmul.f32 %v88_v2, %v41_v25  ;;  %v43_v27 = vmul.f32 %v90_v3, %v41_v25 }
 0x109   :  { %v44_v28 = vadd.f32 0.5, %v42_v26  ;;  %v45_v29 = vadd.f32 0.5, %v43_v27 }
 0x10b   :  { %v46_v30 = vmul.f32 15.0, %v44_v28  ;;  %v47_v31 = vmul.f32 15.0, %v45_v29 }
 0x10d   :  { %v73_v32 = vcvt.f32.s32 %v46_v30  ;;  %v81_v33 = vcvt.f32.s32 %v47_v31  ;;  %v71_v35 = vand.u32 2147483647, %v46_v30  ;;  %v76_v38 = vand.u32 2147483648, %v46_v30 }
 0x10e   :  { %v79_v39 = vand.u32 2147483647, %v47_v31  ;;  %v84_v41 = vand.u32 2147483648, %v47_v31 }
 0x10f   :  { %v74_v34 = vcvt.s32.f32 %v73_v32  ;;  %v82_v36 = vcvt.s32.f32 %v81_v33  ;;  %vm72_vm4 = vcmp.lt.f32.partialorder %v71_v35, 8388608.0 }
 0x110   :  { %vm80_vm5 = vcmp.lt.f32.partialorder %v79_v39, 8388608.0 }
 0x111   :  { %v75_v37 = vand.u32 2147483647, %v74_v34  ;;  %v83_v40 = vand.u32 2147483647, %v82_v36 }
 0x113   :  { %v77_v42 = vor.u32 %v76_v38, %v75_v37  ;;  %v85_v43 = vor.u32 %v84_v41, %v83_v40 }
 0x115   :  { %v78_v44 = vsel %vm72_vm4, %v77_v42, %v46_v30  ;;  %v86_v45 = vsel %vm80_vm5, %v85_v43, %v47_v31 }
 0x116   :  { %v50_v46 = vmul.f32 0.06666667, %v78_v44  ;;  %v51_v47 = vmul.f32 0.06666667, %v86_v45 }
 0x118   :  { %v52_v48 = vmul.f32 2.0, %v50_v46  ;;  %v53_v49 = vmul.f32 2.0, %v51_v47 }
 0x11a   :  { %v65_v50 = vadd.f32 -1.0, %v52_v48  ;;  %v66_v51 = vadd.f32 -1.0, %v53_v49 }
 0x11c   :  { %v57_v52 = vmul.f32 %v65_v50, %v24_v14  ;;  %v58_v53 = vmul.f32 %v66_v51, %v24_v14 }
 0x11e   :  { %59 = vst [vmem:[%s116_s1] sm:$0xff] %v57_v52 }
 0x11f   :  { %60 = vst [vmem:[%s116_s1 + $0x8] sm:$0xff] %v58_v53 }

</bundles_post_ra>
